<compile_context>
chip_gen: v6e
topology: v6e:2x2x1
jax: 0.10.0
libtpu: 0.0.40
codegen_flags: <defaults>
</compile_context>

<pallas_src>
import math
import functools

import jax
import jax.numpy as jnp
from jax.experimental import pallas as pl
from jax.experimental.pallas import tpu as pltpu


def _mha_kernel(x_ref, wq_ref, bq_ref, wk_ref, bk_ref, wv_ref, bv_ref,
                wo_ref, bo_ref, o_ref, *, num_heads, num_hiddens):
    # x_ref : (bt, S, D)                 o_ref : (bt, S, D)
    # w{q,k,v}_ref : (H, D, hd)          b{q,k,v}_ref : (H, 1, hd)
    # wo_ref : (H, hd, D)                bo_ref : (1, D)
    bt, S, D = x_ref.shape
    H = num_heads
    hd = D // H
    g = H * bt
    # NOTE: the PyTorch module scales by sqrt(num_hiddens) (full model dim), not
    # sqrt(head_dim); we reproduce that exactly.
    scale = 1.0 / math.sqrt(num_hiddens)

    x = x_ref[...]                                              # (bt, S, D)

    # Fold (head, batch) -> group axis. group index = h * bt + b.
    # Major-dim broadcast + reshape only (no relayout, no lane slicing).
    xg = jnp.broadcast_to(x[None], (H, bt, S, D)).reshape(g, S, D)

    def rep(w):
        # Replicate each per-head slab across the batch block: (H, a, b) -> (g, a, b).
        return jnp.broadcast_to(w[:, None], (H, bt) + w.shape[1:]
                                ).reshape((g,) + w.shape[1:])

    # Q/K/V projections: (g,S,D) @ (g,D,hd) -> (g,S,hd).
    # Weights are pre-transposed in the wrapper, so no in-kernel .T.
    q = jnp.einsum('gsd,gde->gse', xg, rep(wq_ref[...]),
                   preferred_element_type=jnp.float32) + rep(bq_ref[...])
    k = jnp.einsum('gsd,gde->gse', xg, rep(wk_ref[...]),
                   preferred_element_type=jnp.float32) + rep(bk_ref[...])
    v = jnp.einsum('gsd,gde->gse', xg, rep(wv_ref[...]),
                   preferred_element_type=jnp.float32) + rep(bv_ref[...])

    # Scaled dot-product attention, all (head, batch) groups at once.
    s = jnp.einsum('gqe,gke->gqk', q, k, preferred_element_type=jnp.float32) * scale
    s = s - jnp.max(s, axis=-1, keepdims=True)
    e = jnp.exp(s)
    # EUP reciprocal instead of a VALU divide for the softmax normalization.
    p = e * pl.reciprocal(jnp.sum(e, axis=-1, keepdims=True), approx=True)
    # TODO(synk): dropout(p) omitted — eval-mode identity.
    ctx = jnp.einsum('gqk,gke->gqe', p, v, preferred_element_type=jnp.float32)   # (g,S,hd)

    # Fused "concat heads + W_o": per-group (S,hd)@(hd,D), then sum over heads.
    out_g = jnp.einsum('gqe,geo->gqo', ctx, rep(wo_ref[...]),
                       preferred_element_type=jnp.float32)                       # (g,S,D)
    out = bo_ref[...] + out_g[0:bt]                    # (1,D) broadcasts over (bt,S,D)
    for h in range(1, H):                              # static, contiguous major slices
        out = out + out_g[h * bt:(h + 1) * bt]
    o_ref[...] = out.astype(o_ref.dtype)


def multi_head_attention(x, params, *, num_heads, num_hiddens, batch_block=None):
    B, S, D = x.shape
    H = num_heads
    assert D % H == 0, "query_size must be divisible by num_heads"
    hd = D // H
    bt = B if batch_block is None else batch_block
    assert B % bt == 0, "batch_block must divide batch"

    wq, bq, wk, bk, wv, bv, wo, bo = params

    # One-time, wrapper-side weight re-arrangement (free relative to the kernel):
    #   W_{q,k,v}: (D_out, D_in) -> (H, D_in, hd)   so projection = batched matmul,
    #   W_o:       (D_out, D_in) -> (H, hd, D_out)  so concat+output-proj fuse.
    def split_heads_w(w):
        return w.reshape(H, hd, D).transpose(0, 2, 1)            # (H, D, hd)

    wq_h, wk_h, wv_h = split_heads_w(wq), split_heads_w(wk), split_heads_w(wv)
    bq_h, bk_h, bv_h = (b.reshape(H, 1, hd) for b in (bq, bk, bv))
    wo_h = wo.reshape(D, H, hd).transpose(1, 2, 0)               # (H, hd, D)
    bo_2 = bo.reshape(1, D)

    kernel = functools.partial(_mha_kernel, num_heads=H, num_hiddens=num_hiddens)

    def full_spec(shape):
        return pl.BlockSpec(shape, lambda i: (0,) * len(shape))

    return pl.pallas_call(
        kernel,
        out_shape=jax.ShapeDtypeStruct((B, S, D), x.dtype),
        grid_spec=pltpu.PrefetchScalarGridSpec(
            num_scalar_prefetch=0,
            grid=(B // bt,),                          # fat steps: whole batch by default
            in_specs=[
                pl.BlockSpec((bt, S, D), lambda i: (i, 0, 0)),    # x
                full_spec((H, D, hd)), full_spec((H, 1, hd)),     # W_q, b_q
                full_spec((H, D, hd)), full_spec((H, 1, hd)),     # W_k, b_k
                full_spec((H, D, hd)), full_spec((H, 1, hd)),     # W_v, b_v
                full_spec((H, hd, D)), full_spec((1, D)),         # W_o, b_o
            ],
            out_specs=pl.BlockSpec((bt, S, D), lambda i: (i, 0, 0)),
        ),
        compiler_params=pltpu.CompilerParams(
            dimension_semantics=("parallel",)),
    )(x, wq_h, bq_h, wk_h, bk_h, wv_h, bv_h, wo_h, bo_2)


def _reference(x, params, *, num_heads, num_hiddens):
    """Pure-JAX reference mirroring the PyTorch forward exactly."""
    B, S, D = x.shape
    hd = D // num_heads
    wq, bq, wk, bk, wv, bv, wo, bo = params

    def proj(w, b):
        return x @ w.T + b

    def split_heads(t):   # transpose_qkv
        t = t.reshape(B, S, num_heads, hd).transpose(0, 2, 1, 3)
        return t.reshape(B * num_heads, S, hd)

    q, k, v = (split_heads(proj(wq, bq)), split_heads(proj(wk, bk)),
               split_heads(proj(wv, bv)))
    scores = jnp.einsum('bqd,bkd->bqk', q, k) / math.sqrt(num_hiddens)
    attn = jax.nn.softmax(scores, axis=-1)
    out = jnp.einsum('bqk,bkd->bqd', attn, v)
    out = out.reshape(B, num_heads, S, hd).transpose(0, 2, 1, 3).reshape(B, S, D)
    return out @ wo.T + bo


if __name__ == "__main__":
    # Small shapes consistent with the module: X = (batch, seq, query_size)
    batch, seq, query_size = 2, 8, 32
    num_heads = 4
    num_hiddens = 32          # only used for the 1/sqrt(num_hiddens) scale
    dtype = jnp.float32

    key = jax.random.PRNGKey(0)
    keys = jax.random.split(key, 10)
    bound = 1.0 / math.sqrt(query_size)

    def init_w(k):
        return jax.random.uniform(k, (query_size, query_size), dtype, -bound, bound)

    def init_b(k):
        return jax.random.uniform(k, (query_size,), dtype, -bound, bound)

    params = (init_w(keys[0]), init_b(keys[1]),   # W_q, b_q
              init_w(keys[2]), init_b(keys[3]),   # W_k, b_k
              init_w(keys[4]), init_b(keys[5]),   # W_v, b_v
              init_w(keys[6]), init_b(keys[7]))   # W_o, b_o

    x = jax.random.normal(keys[8], (batch, seq, query_size), dtype)

    out = multi_head_attention(x, params, num_heads=num_heads,
                               num_hiddens=num_hiddens)
    out = jax.block_until_ready(out)

    ref = _reference(x, params, num_heads=num_heads, num_hiddens=num_hiddens)
    assert out.shape == (batch, seq, query_size)
    # Slightly loose tolerance: approx (EUP) reciprocal in the softmax normalizer.
    assert jnp.allclose(out, ref, rtol=2e-3, atol=2e-3), "mismatch vs reference"

    print("KERNEL_OK")
</pallas_src>

<mosaic_0001>
module attributes {stable_mosaic.version = 11 : i64} {
  func.func @_mha_kernel(%arg0: i32, %arg1: memref<2x8x32xf32, #tpu.memory_space<vmem>>, %arg2: memref<4x32x8xf32, #tpu.memory_space<vmem>>, %arg3: memref<4x1x8xf32, #tpu.memory_space<vmem>>, %arg4: memref<4x32x8xf32, #tpu.memory_space<vmem>>, %arg5: memref<4x1x8xf32, #tpu.memory_space<vmem>>, %arg6: memref<4x32x8xf32, #tpu.memory_space<vmem>>, %arg7: memref<4x1x8xf32, #tpu.memory_space<vmem>>, %arg8: memref<4x8x32xf32, #tpu.memory_space<vmem>>, %arg9: memref<1x32xf32, #tpu.memory_space<vmem>>, %arg10: memref<2x8x32xf32, #tpu.memory_space<vmem>>) attributes {dimension_semantics = [#tpu.dimension_semantics<parallel>], iteration_bounds = array<i64: 1>, scalar_prefetch = 0 : i64, scratch_operands = 0 : i64, tpu.core_type = #tpu.core_type<tc>, window_params = [{transform_indices = @transform_0, window_bounds = array<i64: 2, 8, 32>}, {pipeline_mode = #tpu.pipeline_mode<synchronous>, transform_indices = @transform_1, window_bounds = array<i64: 4, 32, 8>}, {pipeline_mode = #tpu.pipeline_mode<synchronous>, transform_indices = @transform_2, window_bounds = array<i64: 4, 1, 8>}, {pipeline_mode = #tpu.pipeline_mode<synchronous>, transform_indices = @transform_3, window_bounds = array<i64: 4, 32, 8>}, {pipeline_mode = #tpu.pipeline_mode<synchronous>, transform_indices = @transform_4, window_bounds = array<i64: 4, 1, 8>}, {pipeline_mode = #tpu.pipeline_mode<synchronous>, transform_indices = @transform_5, window_bounds = array<i64: 4, 32, 8>}, {pipeline_mode = #tpu.pipeline_mode<synchronous>, transform_indices = @transform_6, window_bounds = array<i64: 4, 1, 8>}, {pipeline_mode = #tpu.pipeline_mode<synchronous>, transform_indices = @transform_7, window_bounds = array<i64: 4, 8, 32>}, {pipeline_mode = #tpu.pipeline_mode<synchronous>, transform_indices = @transform_8, window_bounds = array<i64: 1, 32>}, {transform_indices = @transform_9, window_bounds = array<i64: 2, 8, 32>}]} {
    %c0 = arith.constant 0 : index
    %c0_0 = arith.constant 0 : index
    %c0_1 = arith.constant 0 : index
    %0 = vector.load %arg1[%c0, %c0_0, %c0_1] : memref<2x8x32xf32, #tpu.memory_space<vmem>>, vector<2x8x32xf32>
    %1 = vector.shape_cast %0 : vector<2x8x32xf32> to vector<1x2x8x32xf32>
    %2 = vector.shape_cast %1 : vector<1x2x8x32xf32> to vector<1x2x8x32xf32>
    %3 = vector.broadcast %2 : vector<1x2x8x32xf32> to vector<4x2x8x32xf32>
    %4 = vector.shape_cast %3 : vector<4x2x8x32xf32> to vector<8x8x32xf32>
    %c0_2 = arith.constant 0 : index
    %c0_3 = arith.constant 0 : index
    %c0_4 = arith.constant 0 : index
    %5 = vector.load %arg2[%c0_2, %c0_3, %c0_4] : memref<4x32x8xf32, #tpu.memory_space<vmem>>, vector<4x32x8xf32>
    %6 = vector.shape_cast %5 : vector<4x32x8xf32> to vector<4x1x32x8xf32>
    %7 = vector.shape_cast %6 : vector<4x1x32x8xf32> to vector<4x1x32x8xf32>
    %8 = vector.broadcast %7 : vector<4x1x32x8xf32> to vector<4x2x32x8xf32>
    %9 = vector.shape_cast %8 : vector<4x2x32x8xf32> to vector<8x32x8xf32>
    "tpu.trace_start"() <{level = 10 : i32, message = "gsd,gde->gse"}> : () -> ()
    %cst = arith.constant dense<0.000000e+00> : vector<8x8x8xf32>
    %10 = tpu.matmul %4, %9, %cst {dimension_numbers = #tpu.dot_dimension_numbers<[2], [1], [1], [2], [0, 0, 0, 1, 1, 2], [0], [0]>} : vector<8x8x32xf32>, vector<8x32x8xf32>, vector<8x8x8xf32> -> vector<8x8x8xf32>
    "tpu.trace_stop"() : () -> ()
    %c0_5 = arith.constant 0 : index
    %c0_6 = arith.constant 0 : index
    %c0_7 = arith.constant 0 : index
    %11 = vector.load %arg3[%c0_5, %c0_6, %c0_7] : memref<4x1x8xf32, #tpu.memory_space<vmem>>, vector<4x1x8xf32>
    %12 = vector.shape_cast %11 : vector<4x1x8xf32> to vector<4x1x1x8xf32>
    %13 = vector.shape_cast %12 : vector<4x1x1x8xf32> to vector<4x1x1x8xf32>
    %14 = vector.broadcast %13 : vector<4x1x1x8xf32> to vector<4x2x1x8xf32>
    %15 = vector.shape_cast %14 : vector<4x2x1x8xf32> to vector<8x1x8xf32>
    %16 = vector.broadcast %15 : vector<8x1x8xf32> to vector<8x8x8xf32>
    %17 = arith.addf %10, %16 : vector<8x8x8xf32>
    %c0_8 = arith.constant 0 : index
    %c0_9 = arith.constant 0 : index
    %c0_10 = arith.constant 0 : index
    %18 = vector.load %arg4[%c0_8, %c0_9, %c0_10] : memref<4x32x8xf32, #tpu.memory_space<vmem>>, vector<4x32x8xf32>
    %19 = vector.shape_cast %18 : vector<4x32x8xf32> to vector<4x1x32x8xf32>
    %20 = vector.shape_cast %19 : vector<4x1x32x8xf32> to vector<4x1x32x8xf32>
    %21 = vector.broadcast %20 : vector<4x1x32x8xf32> to vector<4x2x32x8xf32>
    %22 = vector.shape_cast %21 : vector<4x2x32x8xf32> to vector<8x32x8xf32>
    "tpu.trace_start"() <{level = 10 : i32, message = "gsd,gde->gse"}> : () -> ()
    %cst_11 = arith.constant dense<0.000000e+00> : vector<8x8x8xf32>
    %23 = tpu.matmul %4, %22, %cst_11 {dimension_numbers = #tpu.dot_dimension_numbers<[2], [1], [1], [2], [0, 0, 0, 1, 1, 2], [0], [0]>} : vector<8x8x32xf32>, vector<8x32x8xf32>, vector<8x8x8xf32> -> vector<8x8x8xf32>
    "tpu.trace_stop"() : () -> ()
    %c0_12 = arith.constant 0 : index
    %c0_13 = arith.constant 0 : index
    %c0_14 = arith.constant 0 : index
    %24 = vector.load %arg5[%c0_12, %c0_13, %c0_14] : memref<4x1x8xf32, #tpu.memory_space<vmem>>, vector<4x1x8xf32>
    %25 = vector.shape_cast %24 : vector<4x1x8xf32> to vector<4x1x1x8xf32>
    %26 = vector.shape_cast %25 : vector<4x1x1x8xf32> to vector<4x1x1x8xf32>
    %27 = vector.broadcast %26 : vector<4x1x1x8xf32> to vector<4x2x1x8xf32>
    %28 = vector.shape_cast %27 : vector<4x2x1x8xf32> to vector<8x1x8xf32>
    %29 = vector.broadcast %28 : vector<8x1x8xf32> to vector<8x8x8xf32>
    %30 = arith.addf %23, %29 : vector<8x8x8xf32>
    %c0_15 = arith.constant 0 : index
    %c0_16 = arith.constant 0 : index
    %c0_17 = arith.constant 0 : index
    %31 = vector.load %arg6[%c0_15, %c0_16, %c0_17] : memref<4x32x8xf32, #tpu.memory_space<vmem>>, vector<4x32x8xf32>
    %32 = vector.shape_cast %31 : vector<4x32x8xf32> to vector<4x1x32x8xf32>
    %33 = vector.shape_cast %32 : vector<4x1x32x8xf32> to vector<4x1x32x8xf32>
    %34 = vector.broadcast %33 : vector<4x1x32x8xf32> to vector<4x2x32x8xf32>
    %35 = vector.shape_cast %34 : vector<4x2x32x8xf32> to vector<8x32x8xf32>
    "tpu.trace_start"() <{level = 10 : i32, message = "gsd,gde->gse"}> : () -> ()
    %cst_18 = arith.constant dense<0.000000e+00> : vector<8x8x8xf32>
    %36 = tpu.matmul %4, %35, %cst_18 {dimension_numbers = #tpu.dot_dimension_numbers<[2], [1], [1], [2], [0, 0, 0, 1, 1, 2], [0], [0]>} : vector<8x8x32xf32>, vector<8x32x8xf32>, vector<8x8x8xf32> -> vector<8x8x8xf32>
    "tpu.trace_stop"() : () -> ()
    %c0_19 = arith.constant 0 : index
    %c0_20 = arith.constant 0 : index
    %c0_21 = arith.constant 0 : index
    %37 = vector.load %arg7[%c0_19, %c0_20, %c0_21] : memref<4x1x8xf32, #tpu.memory_space<vmem>>, vector<4x1x8xf32>
    %38 = vector.shape_cast %37 : vector<4x1x8xf32> to vector<4x1x1x8xf32>
    %39 = vector.shape_cast %38 : vector<4x1x1x8xf32> to vector<4x1x1x8xf32>
    %40 = vector.broadcast %39 : vector<4x1x1x8xf32> to vector<4x2x1x8xf32>
    %41 = vector.shape_cast %40 : vector<4x2x1x8xf32> to vector<8x1x8xf32>
    %42 = vector.broadcast %41 : vector<8x1x8xf32> to vector<8x8x8xf32>
    %43 = arith.addf %36, %42 : vector<8x8x8xf32>
    "tpu.trace_start"() <{level = 10 : i32, message = "gqe,gke->gqk"}> : () -> ()
    %cst_22 = arith.constant dense<0.000000e+00> : vector<8x8x8xf32>
    %44 = tpu.matmul %17, %30, %cst_22 {dimension_numbers = #tpu.dot_dimension_numbers<[2], [2], [1], [1], [0, 0, 0, 1, 1, 1], [0], [0]>} : vector<8x8x8xf32>, vector<8x8x8xf32>, vector<8x8x8xf32> -> vector<8x8x8xf32>
    "tpu.trace_stop"() : () -> ()
    %cst_23 = arith.constant 0.176776692 : f32
    %45 = vector.broadcast %cst_23 : f32 to vector<8x8x8xf32>
    %46 = arith.mulf %44, %45 : vector<8x8x8xf32>
    %cst_24 = arith.constant dense<0xFF800000> : vector<8x8xf32>
    %47 = vector.multi_reduction <maximumf>, %46, %cst_24 [2] : vector<8x8x8xf32> to vector<8x8xf32>
    %48 = vector.shape_cast %47 : vector<8x8xf32> to vector<8x8x1xf32>
    %49 = vector.broadcast %48 : vector<8x8x1xf32> to vector<8x8x8xf32>
    %50 = arith.subf %46, %49 : vector<8x8x8xf32>
    %51 = math.exp %50 : vector<8x8x8xf32>
    %cst_25 = arith.constant dense<0.000000e+00> : vector<8x8xf32>
    %52 = vector.multi_reduction <add>, %51, %cst_25 [2] : vector<8x8x8xf32> to vector<8x8xf32>
    %53 = vector.shape_cast %52 : vector<8x8xf32> to vector<8x8x1xf32>
    %54 = tpu.reciprocal %53 {approx = true} : vector<8x8x1xf32> -> vector<8x8x1xf32>
    %55 = vector.broadcast %54 : vector<8x8x1xf32> to vector<8x8x8xf32>
    %56 = arith.mulf %51, %55 : vector<8x8x8xf32>
    "tpu.trace_start"() <{level = 10 : i32, message = "gqk,gke->gqe"}> : () -> ()
    %cst_26 = arith.constant dense<0.000000e+00> : vector<8x8x8xf32>
    %57 = tpu.matmul %56, %43, %cst_26 {dimension_numbers = #tpu.dot_dimension_numbers<[2], [1], [1], [2], [0, 0, 0, 1, 1, 2], [0], [0]>} : vector<8x8x8xf32>, vector<8x8x8xf32>, vector<8x8x8xf32> -> vector<8x8x8xf32>
    "tpu.trace_stop"() : () -> ()
    %c0_27 = arith.constant 0 : index
    %c0_28 = arith.constant 0 : index
    %c0_29 = arith.constant 0 : index
    %58 = vector.load %arg8[%c0_27, %c0_28, %c0_29] : memref<4x8x32xf32, #tpu.memory_space<vmem>>, vector<4x8x32xf32>
    %59 = vector.shape_cast %58 : vector<4x8x32xf32> to vector<4x1x8x32xf32>
    %60 = vector.shape_cast %59 : vector<4x1x8x32xf32> to vector<4x1x8x32xf32>
    %61 = vector.broadcast %60 : vector<4x1x8x32xf32> to vector<4x2x8x32xf32>
    %62 = vector.shape_cast %61 : vector<4x2x8x32xf32> to vector<8x8x32xf32>
    "tpu.trace_start"() <{level = 10 : i32, message = "gqe,geo->gqo"}> : () -> ()
    %cst_30 = arith.constant dense<0.000000e+00> : vector<8x8x32xf32>
    %63 = tpu.matmul %57, %62, %cst_30 {dimension_numbers = #tpu.dot_dimension_numbers<[2], [1], [1], [2], [0, 0, 0, 1, 1, 2], [0], [0]>} : vector<8x8x8xf32>, vector<8x8x32xf32>, vector<8x8x32xf32> -> vector<8x8x32xf32>
    "tpu.trace_stop"() : () -> ()
    %c0_31 = arith.constant 0 : index
    %c0_32 = arith.constant 0 : index
    %64 = vector.load %arg9[%c0_31, %c0_32] : memref<1x32xf32, #tpu.memory_space<vmem>>, vector<1x32xf32>
    %65 = vector.extract_strided_slice %63 {offsets = [0, 0, 0], sizes = [2, 8, 32], strides = [1, 1, 1]} : vector<8x8x32xf32> to vector<2x8x32xf32>
    %66 = vector.shape_cast %64 : vector<1x32xf32> to vector<1x1x32xf32>
    %67 = vector.broadcast %66 : vector<1x1x32xf32> to vector<2x8x32xf32>
    %68 = arith.addf %67, %65 : vector<2x8x32xf32>
    %69 = vector.extract_strided_slice %63 {offsets = [2, 0, 0], sizes = [2, 8, 32], strides = [1, 1, 1]} : vector<8x8x32xf32> to vector<2x8x32xf32>
    %70 = arith.addf %68, %69 : vector<2x8x32xf32>
    %71 = vector.extract_strided_slice %63 {offsets = [4, 0, 0], sizes = [2, 8, 32], strides = [1, 1, 1]} : vector<8x8x32xf32> to vector<2x8x32xf32>
    %72 = arith.addf %70, %71 : vector<2x8x32xf32>
    %73 = vector.extract_strided_slice %63 {offsets = [6, 0, 0], sizes = [2, 8, 32], strides = [1, 1, 1]} : vector<8x8x32xf32> to vector<2x8x32xf32>
    %74 = arith.addf %72, %73 : vector<2x8x32xf32>
    %c0_33 = arith.constant 0 : index
    %c0_34 = arith.constant 0 : index
    %c0_35 = arith.constant 0 : index
    %75 = vector.load %arg10[%c0_33, %c0_34, %c0_35] : memref<2x8x32xf32, #tpu.memory_space<vmem>>, vector<2x8x32xf32>
    tpu.vector_store %arg10[%c0_33, %c0_34, %c0_35], %74 {strides = array<i32>} : memref<2x8x32xf32, #tpu.memory_space<vmem>>, vector<2x8x32xf32>,
    return
  }
  func.func @transform_0(%arg0: i32) -> (i32, i32, i32) {
    %c0_i32 = arith.constant 0 : i32
    %c0_i32_0 = arith.constant 0 : i32
    %c0_i32_1 = arith.constant 0 : i32
    return %arg0, %c0_i32, %c0_i32_0 : i32, i32, i32
  }
  func.func @transform_1(%arg0: i32) -> (i32, i32, i32) {
    %c0_i32 = arith.constant 0 : i32
    %c0_i32_0 = arith.constant 0 : i32
    %c0_i32_1 = arith.constant 0 : i32
    %c0_i32_2 = arith.constant 0 : i32
    return %c0_i32, %c0_i32_0, %c0_i32_1 : i32, i32, i32
  }
  func.func @transform_2(%arg0: i32) -> (i32, i32, i32) {
    %c0_i32 = arith.constant 0 : i32
    %c0_i32_0 = arith.constant 0 : i32
    %c0_i32_1 = arith.constant 0 : i32
    %c0_i32_2 = arith.constant 0 : i32
    return %c0_i32, %c0_i32_0, %c0_i32_1 : i32, i32, i32
  }
  func.func @transform_3(%arg0: i32) -> (i32, i32, i32) {
    %c0_i32 = arith.constant 0 : i32
    %c0_i32_0 = arith.constant 0 : i32
    %c0_i32_1 = arith.constant 0 : i32
    %c0_i32_2 = arith.constant 0 : i32
    return %c0_i32, %c0_i32_0, %c0_i32_1 : i32, i32, i32
  }
  func.func @transform_4(%arg0: i32) -> (i32, i32, i32) {
    %c0_i32 = arith.constant 0 : i32
    %c0_i32_0 = arith.constant 0 : i32
    %c0_i32_1 = arith.constant 0 : i32
    %c0_i32_2 = arith.constant 0 : i32
    return %c0_i32, %c0_i32_0, %c0_i32_1 : i32, i32, i32
  }
  func.func @transform_5(%arg0: i32) -> (i32, i32, i32) {
    %c0_i32 = arith.constant 0 : i32
    %c0_i32_0 = arith.constant 0 : i32
    %c0_i32_1 = arith.constant 0 : i32
    %c0_i32_2 = arith.constant 0 : i32
    return %c0_i32, %c0_i32_0, %c0_i32_1 : i32, i32, i32
  }
  func.func @transform_6(%arg0: i32) -> (i32, i32, i32) {
    %c0_i32 = arith.constant 0 : i32
    %c0_i32_0 = arith.constant 0 : i32
    %c0_i32_1 = arith.constant 0 : i32
    %c0_i32_2 = arith.constant 0 : i32
    return %c0_i32, %c0_i32_0, %c0_i32_1 : i32, i32, i32
  }
  func.func @transform_7(%arg0: i32) -> (i32, i32, i32) {
    %c0_i32 = arith.constant 0 : i32
    %c0_i32_0 = arith.constant 0 : i32
    %c0_i32_1 = arith.constant 0 : i32
    %c0_i32_2 = arith.constant 0 : i32
    return %c0_i32, %c0_i32_0, %c0_i32_1 : i32, i32, i32
  }
  func.func @transform_8(%arg0: i32) -> (i32, i32) {
    %c0_i32 = arith.constant 0 : i32
    %c0_i32_0 = arith.constant 0 : i32
    %c0_i32_1 = arith.constant 0 : i32
    return %c0_i32, %c0_i32_0 : i32, i32
  }
  func.func @transform_9(%arg0: i32) -> (i32, i32, i32) {
    %c0_i32 = arith.constant 0 : i32
    %c0_i32_0 = arith.constant 0 : i32
    %c0_i32_1 = arith.constant 0 : i32
    return %arg0, %c0_i32, %c0_i32_0 : i32, i32, i32
  }
}

</mosaic_0001>

<bundles_post_ra>
// kernel: tpu_custom_call.1
= control target key start
LH: loop header
LB: loop body
LE: loop exit
PB: predicated region body
PF: predicated region fallthrough
CT: control target
= control target key end

     0   :  { %v4444_v1 = vmov 0.0   ;;  %vm79_vm0 = vcmask 261120   ;;  %vm4445_vm1 = vmmov 0   ;;  %s5053_s0 = inlined_call_operand.vmem [shape: f32[2,8,32], index: 0, kind: input, shape index: {}]   ;;  %s5054_s1 = inlined_call_operand.vmem [shape: f32[4,32,8], index: 1, kind: input, shape index: {}]   ;;  %s5055_s2 = inlined_call_operand.vmem [shape: f32[4,1,8], index: 2, kind: input, shape index: {}]   ;;  %s5056_s3 = inlined_call_operand.vmem [shape: f32[4,32,8], index: 3, kind: input, shape index: {}]   ;;  %s5057_s4 = inlined_call_operand.vmem [shape: f32[4,1,8], index: 4, kind: input, shape index: {}]   ;;  %s5058_s5 = inlined_call_operand.vmem [shape: f32[4,32,8], index: 5, kind: input, shape index: {}]   ;;  %s5059_s6 = inlined_call_operand.vmem [shape: f32[4,1,8], index: 6, kind: input, shape index: {}]   ;;  %s5060_s7 = inlined_call_operand.vmem [shape: f32[4,8,32], index: 7, kind: input, shape index: {}]   ;;  %s5061_s8 = inlined_call_operand.vmem [shape: f32[1,32], index: 8, kind: input, shape index: {}]   ;;  %s5062_s9 = inlined_call_operand.hbm [shape: f32[2,8,32], index: 9, kind: output, shape index: {}]  }
   0x1   :  { %v38_v0 = vld [vmem:[%s5054_s1 + $0x18] sm:$0xff]  ;;  %4001 = vmatprep.subr.mxu0 %v4444_v1  ;;  %4012 = vmatprep.subr.mxu1 %v4444_v1  ;;  %v37_v2 = vld [vmem:[%s5054_s1 + $0x10] sm:$0xff]  ;;  %v36_v3 = vld [vmem:[%s5054_s1 + $0x8] sm:$0xff] }
   0x2   :  { %4002 = vmatpush3.msra.mxu0 %v38_v0  ;;  %4013 = vmatpush3.msra.mxu1 %v38_v0  ;;  %v35_v4 = vld [vmem:[%s5054_s1] sm:$0xff]  ;;  %v4527_v6 = vld [vmem:[%s5053_s0 + $0x8] sm:$0xff]  ;;  %v42_v7 = vld [vmem:[%s5054_s1 + $0x38] sm:$0xff] }
   0x3   :  { %4003 = vmatprep.subr.mxu0 %v4444_v1  ;;  %4014 = vmatprep.subr.mxu1 %v4444_v1  ;;  %v4522_v5 = vld [vmem:[%s5053_s0] sm:$0xff]  ;;  %v41_v8 = vld [vmem:[%s5054_s1 + $0x30] sm:$0xff] }
   0x4   :  { %4004 = vmatpush3.msra.mxu0 %v37_v2  ;;  %4015 = vmatpush3.msra.mxu1 %v37_v2 }
   0x5   :  { %4005 = vmatprep.subr.mxu0 %v4444_v1  ;;  %4016 = vmatprep.subr.mxu1 %v4444_v1 }
   0x6   :  { %4006 = vmatpush3.msra.mxu0 %v36_v3  ;;  %4017 = vmatpush3.msra.mxu1 %v36_v3 }
   0x7   :  { %4007 = vmatprep.subr.mxu0 %v4444_v1  ;;  %4018 = vmatprep.subr.mxu1 %v4444_v1 }
   0x8   :  { %4008 = vmatpush3.msra.mxu0 %v35_v4  ;;  %4009 = vmatprep.mubr.msk.f32.mxu0 %vm4445_vm1, %v4444_v1 }
   0x9   :  { %4019 = vmatpush3.msra.mxu1 %v35_v4  ;;  %4020 = vmatprep.mubr.msk.f32.mxu1 %vm4445_vm1, %v4444_v1 }
   0xa   :  { %4010 = vmatmul.mubr.msk.f32.vlgmr.msra.gmra.mxu0 %vm79_vm0, %v4522_v5  ;;  %4021 = vmatmul.mubr.msk.f32.vlgmr.msra.gmra.mxu1 %vm79_vm0, %v4527_v6 }
   0xb   :  { %4023 = vmatprep.subr.mxu0 %v4444_v1  ;;  %4034 = vmatprep.subr.mxu1 %v4444_v1 }
   0xc   :  { %14 = vsyncpa [#allocation3], 0  ;;  %4024 = vmatpush3.msra.mxu0 %v42_v7  ;;  %4035 = vmatpush3.msra.mxu1 %v42_v7  ;;  %v40_v9 = vld [vmem:[%s5054_s1 + $0x28] sm:$0xff]  ;;  %v39_v10 = vld [vmem:[%s5054_s1 + $0x20] sm:$0xff]  ;;  %vm1854_vm2 = vcmask 64512   ;;  %s4446_s20 = smov [#allocation2]  }
   0xd   :  { %4025 = vmatprep.subr.mxu0 %v4444_v1  ;;  %4036 = vmatprep.subr.mxu1 %v4444_v1  ;;  %v46_v11 = vld [vmem:[%s5054_s1 + $0x58] sm:$0xff]  ;;  %v45_v12 = vld [vmem:[%s5054_s1 + $0x50] sm:$0xff]  ;;  %v44_v13 = vld [vmem:[%s5054_s1 + $0x48] sm:$0xff]  ;;  %s3753_s21 = sshll.u32 %s4446_s20, 4  ;;  %s3754_s21 = int_to_ptr.vmem [resolvable:$true] %s3753_s21 }
   0xe   :  { %4026 = vmatpush3.msra.mxu0 %v41_v8  ;;  %4037 = vmatpush3.msra.mxu1 %v41_v8  ;;  %v43_v14 = vld [vmem:[%s5054_s1 + $0x40] sm:$0xff]  ;;  %v50_v15 = vld [vmem:[%s5054_s1 + $0x78] sm:$0xff]  ;;  %v49_v16 = vld [vmem:[%s5054_s1 + $0x70] sm:$0xff]  ;;  %p4427_p1 = scmp.lt.s32.totalorder %s3754_s21, %s3754_s21 }
   0xf   :  { %4027 = vmatprep.subr.mxu0 %v4444_v1  ;;  %4038 = vmatprep.subr.mxu1 %v4444_v1  ;;  %v48_v17 = vld [vmem:[%s5054_s1 + $0x68] sm:$0xff]  ;;  %v47_v18 = vld [vmem:[%s5054_s1 + $0x60] sm:$0xff]  ;;  %v649_v19 = vld [vmem:[%s5056_s3 + $0x18] sm:$0xff] }
  0x10   :  { %4028 = vmatpush3.msra.mxu0 %v40_v9  ;;  %4039 = vmatpush3.msra.mxu1 %v40_v9  ;;  %v648_v20 = vld [vmem:[%s5056_s3 + $0x10] sm:$0xff]  ;;  %v647_v21 = vld [vmem:[%s5056_s3 + $0x8] sm:$0xff]  ;;  %v646_v22 = vld [vmem:[%s5056_s3] sm:$0xff] }
  0x11   :  { %4029 = vmatprep.subr.mxu0 %v4444_v1  ;;  %4040 = vmatprep.subr.mxu1 %v4444_v1  ;;  %v653_v23 = vld [vmem:[%s5056_s3 + $0x38] sm:$0xff]  ;;  %v652_v24 = vld [vmem:[%s5056_s3 + $0x30] sm:$0xff]  ;;  %v651_v25 = vld [vmem:[%s5056_s3 + $0x28] sm:$0xff] }
  0x12   :  { %4030 = vmatpush3.msra.mxu0 %v39_v10  ;;  %4031 = vmatprep.mubr.msk.f32.mxu0 %vm4445_vm1, %v4444_v1  ;;  %v650_v26 = vld [vmem:[%s5056_s3 + $0x20] sm:$0xff]  ;;  %v657_v27 = vld [vmem:[%s5056_s3 + $0x58] sm:$0xff]  ;;  %v656_v28 = vld [vmem:[%s5056_s3 + $0x50] sm:$0xff] }
  0x13   :  { %4041 = vmatpush3.msra.mxu1 %v39_v10  ;;  %4042 = vmatprep.mubr.msk.f32.mxu1 %vm4445_vm1, %v4444_v1  ;;  %v655_v29 = vld [vmem:[%s5056_s3 + $0x48] sm:$0xff]  ;;  %v654_v30 = vld [vmem:[%s5056_s3 + $0x40] sm:$0xff]  ;;  %v661_v31 = vld [vmem:[%s5056_s3 + $0x78] sm:$0xff] }
  0x14   :  { %4032 = vmatmul.mubr.msk.f32.vlgmr.msra.gmra.mxu0 %vm79_vm0, %v4522_v5  ;;  %4043 = vmatmul.mubr.msk.f32.vlgmr.msra.gmra.mxu1 %vm79_vm0, %v4527_v6  ;;  %v660_v32 = vld [vmem:[%s5056_s3 + $0x70] sm:$0xff]  ;;  %v659_v33 = vld [vmem:[%s5056_s3 + $0x68] sm:$0xff]  ;;  %v658_v34 = vld [vmem:[%s5056_s3 + $0x60] sm:$0xff] }
  0x15   :  { %4045 = vmatprep.subr.mxu0 %v4444_v1  ;;  %4056 = vmatprep.subr.mxu1 %v4444_v1  ;;  %v1253_v35 = vld [vmem:[%s5058_s5 + $0x18] sm:$0xff]  ;;  %v1252_v36 = vld [vmem:[%s5058_s5 + $0x10] sm:$0xff]  ;;  %v1251_v37 = vld [vmem:[%s5058_s5 + $0x8] sm:$0xff] }
  0x16   :  { %4046 = vmatpush3.msra.mxu0 %v46_v11  ;;  %4057 = vmatpush3.msra.mxu1 %v46_v11  ;;  %v1250_v38 = vld [vmem:[%s5058_s5] sm:$0xff]  ;;  %v1257_v39 = vld [vmem:[%s5058_s5 + $0x38] sm:$0xff]  ;;  %v1256_v40 = vld [vmem:[%s5058_s5 + $0x30] sm:$0xff] }
  0x17   :  { %4047 = vmatprep.subr.mxu0 %v4444_v1  ;;  %4058 = vmatprep.subr.mxu1 %v4444_v1  ;;  %v1255_v41 = vld [vmem:[%s5058_s5 + $0x28] sm:$0xff]  ;;  %v1254_v42 = vld [vmem:[%s5058_s5 + $0x20] sm:$0xff]  ;;  %v1261_v43 = vld [vmem:[%s5058_s5 + $0x58] sm:$0xff] }
  0x18   :  { %4048 = vmatpush3.msra.mxu0 %v45_v12  ;;  %4059 = vmatpush3.msra.mxu1 %v45_v12  ;;  %v1260_v44 = vld [vmem:[%s5058_s5 + $0x50] sm:$0xff]  ;;  %v1259_v45 = vld [vmem:[%s5058_s5 + $0x48] sm:$0xff]  ;;  %v1258_v46 = vld [vmem:[%s5058_s5 + $0x40] sm:$0xff] }
  0x19   :  { %4049 = vmatprep.subr.mxu0 %v4444_v1  ;;  %4060 = vmatprep.subr.mxu1 %v4444_v1  ;;  %v1265_v47 = vld [vmem:[%s5058_s5 + $0x78] sm:$0xff]  ;;  %v1264_v48 = vld [vmem:[%s5058_s5 + $0x70] sm:$0xff]  ;;  %v1263_v49 = vld [vmem:[%s5058_s5 + $0x68] sm:$0xff] }
  0x1a   :  { %4050 = vmatpush3.msra.mxu0 %v44_v13  ;;  %4061 = vmatpush3.msra.mxu1 %v44_v13  ;;  %v1262_v50 = vld [vmem:[%s5058_s5 + $0x60] sm:$0xff] }
  0x1b   :  { %4051 = vmatprep.subr.mxu0 %v4444_v1  ;;  %4062 = vmatprep.subr.mxu1 %v4444_v1  ;;  %v3776_v4 = vld [vmem:[%s5057_s4] ss:$0 sm:$0xff] }
  0x1c   :  { %4052 = vmatpush3.msra.mxu0 %v43_v14  ;;  %4053 = vmatprep.mubr.msk.f32.mxu0 %vm4445_vm1, %v4444_v1  ;;  %v3764_v7 = vld [vmem:[%s5055_s2] ss:$0 sm:$0xff] }
  0x1d   :  { %4063 = vmatpush3.msra.mxu1 %v43_v14  ;;  %4064 = vmatprep.mubr.msk.f32.mxu1 %vm4445_vm1, %v4444_v1  ;;  %v3777_v14 = vld [vmem:[%s5057_s4 + $0x1] ss:$0 sm:$0xff] }
  0x1e   :  { %4054 = vmatmul.mubr.msk.f32.vlgmr.msra.gmra.mxu0 %vm79_vm0, %v4522_v5  ;;  %4065 = vmatmul.mubr.msk.f32.vlgmr.msra.gmra.mxu1 %vm79_vm0, %v4527_v6 }
  0x1f   :  { %4067 = vmatprep.subr.mxu0 %v4444_v1  ;;  %4078 = vmatprep.subr.mxu1 %v4444_v1 }
  0x20   :  { %4068 = vmatpush3.msra.mxu0 %v50_v15  ;;  %4079 = vmatpush3.msra.mxu1 %v50_v15 }
  0x21   :  { %4069 = vmatprep.subr.mxu0 %v4444_v1  ;;  %4080 = vmatprep.subr.mxu1 %v4444_v1 }
  0x22   :  { %4070 = vmatpush3.msra.mxu0 %v49_v16  ;;  %4081 = vmatpush3.msra.mxu1 %v49_v16 }
  0x23   :  { %4071 = vmatprep.subr.mxu0 %v4444_v1  ;;  %4082 = vmatprep.subr.mxu1 %v4444_v1 }
  0x24   :  { %4072 = vmatpush3.msra.mxu0 %v48_v17  ;;  %4083 = vmatpush3.msra.mxu1 %v48_v17  ;;  %v3765_v17 = vld [vmem:[%s5055_s2 + $0x1] ss:$0 sm:$0xff] }
  0x25   :  { %4073 = vmatprep.subr.mxu0 %v4444_v1  ;;  %4084 = vmatprep.subr.mxu1 %v4444_v1 }
  0x26   :  { %4074 = vmatpush3.msra.mxu0 %v47_v18  ;;  %4075 = vmatprep.mubr.msk.f32.mxu0 %vm4445_vm1, %v4444_v1 }
  0x27   :  { %4085 = vmatpush3.msra.mxu1 %v47_v18  ;;  %4086 = vmatprep.mubr.msk.f32.mxu1 %vm4445_vm1, %v4444_v1 }
  0x28   :  { %4076 = vmatmul.mubr.msk.f32.vlgmr.msra.gmra.mxu0 %vm79_vm0, %v4522_v5  ;;  %4087 = vmatmul.mubr.msk.f32.vlgmr.msra.gmra.mxu1 %vm79_vm0, %v4527_v6 }
  0x29   :  { %4089 = vmatprep.subr.mxu0 %v4444_v1  ;;  %4100 = vmatprep.subr.mxu1 %v4444_v1 }
  0x2a   :  { %4090 = vmatpush3.msra.mxu0 %v649_v19  ;;  %4101 = vmatpush3.msra.mxu1 %v649_v19 }
  0x2b   :  { %4091 = vmatprep.subr.mxu0 %v4444_v1  ;;  %4102 = vmatprep.subr.mxu1 %v4444_v1 }
  0x2c   :  { %4092 = vmatpush3.msra.mxu0 %v648_v20  ;;  %4103 = vmatpush3.msra.mxu1 %v648_v20 }
  0x2d   :  { %4093 = vmatprep.subr.mxu0 %v4444_v1  ;;  %4104 = vmatprep.subr.mxu1 %v4444_v1 }
  0x2e   :  { %4094 = vmatpush3.msra.mxu0 %v647_v21  ;;  %4105 = vmatpush3.msra.mxu1 %v647_v21 }
  0x2f   :  { %4095 = vmatprep.subr.mxu0 %v4444_v1  ;;  %4106 = vmatprep.subr.mxu1 %v4444_v1 }
  0x30   :  { %4096 = vmatpush3.msra.mxu0 %v646_v22  ;;  %4097 = vmatprep.mubr.msk.f32.mxu0 %vm4445_vm1, %v4444_v1 }
  0x31   :  { %4107 = vmatpush3.msra.mxu1 %v646_v22  ;;  %4108 = vmatprep.mubr.msk.f32.mxu1 %vm4445_vm1, %v4444_v1 }
  0x32   :  { %4098 = vmatmul.mubr.msk.f32.vlgmr.msra.gmra.mxu0 %vm79_vm0, %v4522_v5  ;;  %4109 = vmatmul.mubr.msk.f32.vlgmr.msra.gmra.mxu1 %vm79_vm0, %v4527_v6 }
  0x33   :  { %4111 = vmatprep.subr.mxu0 %v4444_v1  ;;  %4122 = vmatprep.subr.mxu1 %v4444_v1 }
  0x34   :  { %4112 = vmatpush3.msra.mxu0 %v653_v23  ;;  %4123 = vmatpush3.msra.mxu1 %v653_v23 }
  0x35   :  { %4113 = vmatprep.subr.mxu0 %v4444_v1  ;;  %4124 = vmatprep.subr.mxu1 %v4444_v1 }
  0x36   :  { %4114 = vmatpush3.msra.mxu0 %v652_v24  ;;  %4125 = vmatpush3.msra.mxu1 %v652_v24  ;;  %v3778_v24 = vld [vmem:[%s5057_s4 + $0x2] ss:$0 sm:$0xff] }
  0x37   :  { %4115 = vmatprep.subr.mxu0 %v4444_v1  ;;  %4126 = vmatprep.subr.mxu1 %v4444_v1 }
  0x38   :  { %4116 = vmatpush3.msra.mxu0 %v651_v25  ;;  %4127 = vmatpush3.msra.mxu1 %v651_v25 }
  0x39   :  { %4117 = vmatprep.subr.mxu0 %v4444_v1  ;;  %4128 = vmatprep.subr.mxu1 %v4444_v1 }
  0x3a   :  { %4118 = vmatpush3.msra.mxu0 %v650_v26  ;;  %4119 = vmatprep.mubr.msk.f32.mxu0 %vm4445_vm1, %v4444_v1 }
  0x3b   :  { %4129 = vmatpush3.msra.mxu1 %v650_v26  ;;  %4130 = vmatprep.mubr.msk.f32.mxu1 %vm4445_vm1, %v4444_v1 }
  0x3c   :  { %4120 = vmatmul.mubr.msk.f32.vlgmr.msra.gmra.mxu0 %vm79_vm0, %v4522_v5  ;;  %4131 = vmatmul.mubr.msk.f32.vlgmr.msra.gmra.mxu1 %vm79_vm0, %v4527_v6 }
  0x3d   :  { %4133 = vmatprep.subr.mxu0 %v4444_v1  ;;  %4144 = vmatprep.subr.mxu1 %v4444_v1 }
  0x3e   :  { %4134 = vmatpush3.msra.mxu0 %v657_v27  ;;  %4145 = vmatpush3.msra.mxu1 %v657_v27  ;;  %v3766_v27 = vld [vmem:[%s5055_s2 + $0x2] ss:$0 sm:$0xff] }
  0x3f   :  { %4135 = vmatprep.subr.mxu0 %v4444_v1  ;;  %4146 = vmatprep.subr.mxu1 %v4444_v1 }
  0x40   :  { %4136 = vmatpush3.msra.mxu0 %v656_v28  ;;  %4147 = vmatpush3.msra.mxu1 %v656_v28 }
  0x41   :  { %4137 = vmatprep.subr.mxu0 %v4444_v1  ;;  %4148 = vmatprep.subr.mxu1 %v4444_v1 }
  0x42   :  { %4138 = vmatpush3.msra.mxu0 %v655_v29  ;;  %4149 = vmatpush3.msra.mxu1 %v655_v29 }
  0x43   :  { %4139 = vmatprep.subr.mxu0 %v4444_v1  ;;  %4150 = vmatprep.subr.mxu1 %v4444_v1 }
  0x44   :  { %4140 = vmatpush3.msra.mxu0 %v654_v30  ;;  %4141 = vmatprep.mubr.msk.f32.mxu0 %vm4445_vm1, %v4444_v1 }
  0x45   :  { %4151 = vmatpush3.msra.mxu1 %v654_v30  ;;  %4152 = vmatprep.mubr.msk.f32.mxu1 %vm4445_vm1, %v4444_v1 }
  0x46   :  { %4142 = vmatmul.mubr.msk.f32.vlgmr.msra.gmra.mxu0 %vm79_vm0, %v4522_v5  ;;  %4153 = vmatmul.mubr.msk.f32.vlgmr.msra.gmra.mxu1 %vm79_vm0, %v4527_v6 }
  0x47   :  { %4155 = vmatprep.subr.mxu0 %v4444_v1  ;;  %4166 = vmatprep.subr.mxu1 %v4444_v1 }
  0x48   :  { %4156 = vmatpush3.msra.mxu0 %v661_v31  ;;  %4167 = vmatpush3.msra.mxu1 %v661_v31 }
  0x49   :  { %4157 = vmatprep.subr.mxu0 %v4444_v1  ;;  %4168 = vmatprep.subr.mxu1 %v4444_v1 }
  0x4a   :  { %4158 = vmatpush3.msra.mxu0 %v660_v32  ;;  %4169 = vmatpush3.msra.mxu1 %v660_v32 }
  0x4b   :  { %4159 = vmatprep.subr.mxu0 %v4444_v1  ;;  %4170 = vmatprep.subr.mxu1 %v4444_v1 }
  0x4c   :  { %4160 = vmatpush3.msra.mxu0 %v659_v33  ;;  %4171 = vmatpush3.msra.mxu1 %v659_v33 }
  0x4d   :  { %4161 = vmatprep.subr.mxu0 %v4444_v1  ;;  %4172 = vmatprep.subr.mxu1 %v4444_v1 }
  0x4e   :  { %4162 = vmatpush3.msra.mxu0 %v658_v34  ;;  %4163 = vmatprep.mubr.msk.f32.mxu0 %vm4445_vm1, %v4444_v1 }
  0x4f   :  { %4173 = vmatpush3.msra.mxu1 %v658_v34  ;;  %4174 = vmatprep.mubr.msk.f32.mxu1 %vm4445_vm1, %v4444_v1  ;;  %v3779_v34 = vld [vmem:[%s5057_s4 + $0x3] ss:$0 sm:$0xff] }
  0x50   :  { %4164 = vmatmul.mubr.msk.f32.vlgmr.msra.gmra.mxu0 %vm79_vm0, %v4522_v5  ;;  %4175 = vmatmul.mubr.msk.f32.vlgmr.msra.gmra.mxu1 %vm79_vm0, %v4527_v6 }
  0x51   :  { %4177 = vmatprep.subr.mxu0 %v4444_v1  ;;  %4188 = vmatprep.subr.mxu1 %v4444_v1 }
  0x52   :  { %4178 = vmatpush3.msra.mxu0 %v1253_v35  ;;  %4189 = vmatpush3.msra.mxu1 %v1253_v35 }
  0x53   :  { %4179 = vmatprep.subr.mxu0 %v4444_v1  ;;  %4190 = vmatprep.subr.mxu1 %v4444_v1 }
  0x54   :  { %4180 = vmatpush3.msra.mxu0 %v1252_v36  ;;  %4191 = vmatpush3.msra.mxu1 %v1252_v36 }
  0x55   :  { %4181 = vmatprep.subr.mxu0 %v4444_v1  ;;  %4192 = vmatprep.subr.mxu1 %v4444_v1 }
  0x56   :  { %4182 = vmatpush3.msra.mxu0 %v1251_v37  ;;  %4193 = vmatpush3.msra.mxu1 %v1251_v37  ;;  %v3767_v37 = vld [vmem:[%s5055_s2 + $0x3] ss:$0 sm:$0xff] }
  0x57   :  { %4183 = vmatprep.subr.mxu0 %v4444_v1  ;;  %4194 = vmatprep.subr.mxu1 %v4444_v1 }
  0x58   :  { %4184 = vmatpush3.msra.mxu0 %v1250_v38  ;;  %4195 = vmatpush3.msra.mxu1 %v1250_v38 }
  0x59   :  { %4185 = vmatprep.mubr.msk.f32.mxu0 %vm4445_vm1, %v4444_v1  ;;  %4196 = vmatprep.mubr.msk.f32.mxu1 %vm4445_vm1, %v4444_v1 }
  0x5a   :  { %4199 = vmatprep.subr.mxu0 %v4444_v1  ;;  %4210 = vmatprep.subr.mxu1 %v4444_v1 }
  0x5b   :  { %4186 = vmatmul.mubr.msk.f32.vlgmr.msra.gmra.mxu0 %vm79_vm0, %v4522_v5  ;;  %4197 = vmatmul.mubr.msk.f32.vlgmr.msra.gmra.mxu1 %vm79_vm0, %v4527_v6 }
  0x5c   :  { %4200 = vmatpush3.msra.mxu0 %v1257_v39  ;;  %4211 = vmatpush3.msra.mxu1 %v1257_v39 }
  0x5d   :  { %4201 = vmatprep.subr.mxu0 %v4444_v1  ;;  %4212 = vmatprep.subr.mxu1 %v4444_v1 }
  0x5e   :  { %4202 = vmatpush3.msra.mxu0 %v1256_v40  ;;  %4213 = vmatpush3.msra.mxu1 %v1256_v40 }
  0x5f   :  { %4203 = vmatprep.subr.mxu0 %v4444_v1  ;;  %4214 = vmatprep.subr.mxu1 %v4444_v1 }
  0x60   :  { %4204 = vmatpush3.msra.mxu0 %v1255_v41  ;;  %4215 = vmatpush3.msra.mxu1 %v1255_v41 }
  0x61   :  { %4205 = vmatprep.subr.mxu0 %v4444_v1  ;;  %4216 = vmatprep.subr.mxu1 %v4444_v1 }
  0x62   :  { %4206 = vmatpush3.msra.mxu0 %v1254_v42  ;;  %4217 = vmatpush3.msra.mxu1 %v1254_v42 }
  0x63   :  { %4207 = vmatprep.mubr.msk.f32.mxu0 %vm4445_vm1, %v4444_v1  ;;  %4218 = vmatprep.mubr.msk.f32.mxu1 %vm4445_vm1, %v4444_v1 }
  0x64   :  { %4221 = vmatprep.subr.mxu0 %v4444_v1  ;;  %4232 = vmatprep.subr.mxu1 %v4444_v1 }
  0x65   :  { %4208 = vmatmul.mubr.msk.f32.vlgmr.msra.gmra.mxu0 %vm79_vm0, %v4522_v5  ;;  %4219 = vmatmul.mubr.msk.f32.vlgmr.msra.gmra.mxu1 %vm79_vm0, %v4527_v6 }
  0x66   :  { %4222 = vmatpush3.msra.mxu0 %v1261_v43  ;;  %4233 = vmatpush3.msra.mxu1 %v1261_v43 }
  0x67   :  { %4223 = vmatprep.subr.mxu0 %v4444_v1  ;;  %4234 = vmatprep.subr.mxu1 %v4444_v1 }
  0x68   :  { %4224 = vmatpush3.msra.mxu0 %v1260_v44  ;;  %4235 = vmatpush3.msra.mxu1 %v1260_v44  ;;  %v3788_v44 = vld [vmem:[%s5059_s6] ss:$0 sm:$0xff] }
  0x69   :  { %4225 = vmatprep.subr.mxu0 %v4444_v1  ;;  %4236 = vmatprep.subr.mxu1 %v4444_v1 }
  0x6a   :  { %4226 = vmatpush3.msra.mxu0 %v1259_v45  ;;  %4237 = vmatpush3.msra.mxu1 %v1259_v45 }
  0x6b   :  { %4227 = vmatprep.subr.mxu0 %v4444_v1  ;;  %4238 = vmatprep.subr.mxu1 %v4444_v1 }
  0x6c   :  { %4228 = vmatpush3.msra.mxu0 %v1258_v46  ;;  %4239 = vmatpush3.msra.mxu1 %v1258_v46 }
  0x6d   :  { %4229 = vmatprep.mubr.msk.f32.mxu0 %vm4445_vm1, %v4444_v1  ;;  %4240 = vmatprep.mubr.msk.f32.mxu1 %vm4445_vm1, %v4444_v1 }
  0x6e   :  { %4243 = vmatprep.subr.mxu0 %v4444_v1  ;;  %4254 = vmatprep.subr.mxu1 %v4444_v1 }
  0x6f   :  { %4230 = vmatmul.mubr.msk.f32.vlgmr.msra.gmra.mxu0 %vm79_vm0, %v4522_v5  ;;  %4241 = vmatmul.mubr.msk.f32.vlgmr.msra.gmra.mxu1 %vm79_vm0, %v4527_v6 }
  0x70   :  { %4244 = vmatpush3.msra.mxu0 %v1265_v47  ;;  %4255 = vmatpush3.msra.mxu1 %v1265_v47 }
  0x71   :  { %4245 = vmatprep.subr.mxu0 %v4444_v1  ;;  %4256 = vmatprep.subr.mxu1 %v4444_v1 }
  0x72   :  { %4246 = vmatpush3.msra.mxu0 %v1264_v48  ;;  %4257 = vmatpush3.msra.mxu1 %v1264_v48 }
  0x73   :  { %4247 = vmatprep.subr.mxu0 %v4444_v1  ;;  %4258 = vmatprep.subr.mxu1 %v4444_v1 }
  0x74   :  { %4248 = vmatpush3.msra.mxu0 %v1263_v49  ;;  %4259 = vmatpush3.msra.mxu1 %v1263_v49 }
  0x75   :  { %4249 = vmatprep.subr.mxu0 %v4444_v1  ;;  %4260 = vmatprep.subr.mxu1 %v4444_v1 }
  0x76   :  { %4250 = vmatpush3.msra.mxu0 %v1262_v50  ;;  %4251 = vmatprep.mubr.msk.f32.mxu0 %vm4445_vm1, %v4444_v1 }
  0x77   :  { %4261 = vmatpush3.msra.mxu1 %v1262_v50  ;;  %4262 = vmatprep.mubr.msk.f32.mxu1 %vm4445_vm1, %v4444_v1 }
  0x78   :  { %4252 = vmatmul.mubr.msk.f32.vlgmr.msra.gmra.mxu0 %vm79_vm0, %v4522_v5  ;;  %4263 = vmatmul.mubr.msk.f32.vlgmr.msra.gmra.mxu1 %vm79_vm0, %v4527_v6 }
  0x79   :  { %4265 = vmatprep.subr.mxu0 %v4444_v1  ;;  %4270 = vmatprep.subr.mxu1 %v4444_v1 }
  0x7a   :  { %4267 = vmatprep.mubr.msk.f32.mxu0 %vm4445_vm1, %v4444_v1  ;;  %4272 = vmatprep.mubr.msk.f32.mxu1 %vm4445_vm1, %v4444_v1 }
  0xca   :  { %v149_v51 = vpop.f32.mrf.mxu0  ;;  %v222_v52 = vpop.f32.mrf.mxu1 }
  0xcb   :  { %v150_v12 = vadd.f32 %v3764_v7, %v149_v51  ;;  %v223_v13 = vadd.f32 %v3764_v7, %v222_v52 }
  0xcc   :  { %v4011_v53 = vpop.f32.mrf.mxu0  ;;  %v4022_v54 = vpop.f32.mrf.mxu1 }
  0xd4   :  { %v292_v55 = vpop.f32.mrf.mxu0  ;;  %v362_v56 = vpop.f32.mrf.mxu1 }
  0xd5   :  { %v293_v22 = vadd.f32 %v3765_v17, %v292_v55  ;;  %v363_v23 = vadd.f32 %v3765_v17, %v362_v56 }
  0xd6   :  { %v4033_v57 = vpop.f32.mrf.mxu0  ;;  %v4044_v58 = vpop.f32.mrf.mxu1 }
  0xde   :  { %v432_v59 = vpop.f32.mrf.mxu0  ;;  %v502_v60 = vpop.f32.mrf.mxu1 }
  0xdf   :  { %v433_v32 = vadd.f32 %v3766_v27, %v432_v59  ;;  %v503_v33 = vadd.f32 %v3766_v27, %v502_v60 }
  0xe0   :  { %v4055_v61 = vpop.f32.mrf.mxu0  ;;  %v4066_v62 = vpop.f32.mrf.mxu1 }
  0xe8   :  { %v4851_v63 = vpop.f32.mrf.mxu0  ;;  %v4853_v0 = vpop.f32.mrf.mxu1 }
  0xe9   :  { %v573_v42 = vadd.f32 %v3767_v37, %v4851_v63  ;;  %v643_v43 = vadd.f32 %v3767_v37, %v4853_v0 }
  0xea   :  { %v4077_v2 = vpop.f32.mrf.mxu0  ;;  %v4088_v3 = vpop.f32.mrf.mxu1 }
  0xf2   :  { %v756_v5 = vpop.f32.mrf.mxu0  ;;  %v826_v6 = vpop.f32.mrf.mxu1 }
  0xf3   :  { %v757_v8 = vadd.f32 %v3776_v4, %v756_v5  ;;  %v827_v9 = vadd.f32 %v3776_v4, %v826_v6 }
  0xf4   :  { %v4099_v10 = vpop.f32.mrf.mxu0  ;;  %v4110_v11 = vpop.f32.mrf.mxu1 }
  0xf5   :  { %4266 = vmatpush3.xpose.msk.msra.mxu0 %vm1854_vm2, %v757_v8  ;;  %4271 = vmatpush3.xpose.msk.msra.mxu1 %vm1854_vm2, %v827_v9 }
  0xf6   :  { %4275 = vmatprep.subr.mxu0 %v4444_v1  ;;  %4280 = vmatprep.subr.mxu1 %v4444_v1 }
  0xf8   :  { %4268 = vmatmul.mubr.msk.f32.vlgmr.msra.gmra.mxu0 %vm1854_vm2, %v150_v12  ;;  %4273 = vmatmul.mubr.msk.f32.vlgmr.msra.gmra.mxu1 %vm1854_vm2, %v223_v13 }
  0xf9   :  { %4277 = vmatprep.mubr.msk.f32.mxu0 %vm4445_vm1, %v4444_v1  ;;  %4282 = vmatprep.mubr.msk.f32.mxu1 %vm4445_vm1, %v4444_v1 }
  0xfc   :  { %v896_v15 = vpop.f32.mrf.mxu0  ;;  %v966_v16 = vpop.f32.mrf.mxu1 }
  0xfd   :  { %v897_v18 = vadd.f32 %v3777_v14, %v896_v15  ;;  %v967_v19 = vadd.f32 %v3777_v14, %v966_v16 }
  0xfe   :  { %v4121_v20 = vpop.f32.mrf.mxu0  ;;  %v4132_v21 = vpop.f32.mrf.mxu1 }
  0xff   :  { %4276 = vmatpush3.xpose.msk.msra.mxu0 %vm1854_vm2, %v897_v18  ;;  %4281 = vmatpush3.xpose.msk.msra.mxu1 %vm1854_vm2, %v967_v19 }
 0x100   :  { %4285 = vmatprep.subr.mxu0 %v4444_v1  ;;  %4290 = vmatprep.subr.mxu1 %v4444_v1 }
 0x102   :  { %4278 = vmatmul.mubr.msk.f32.vlgmr.msra.gmra.mxu0 %vm1854_vm2, %v293_v22  ;;  %4283 = vmatmul.mubr.msk.f32.vlgmr.msra.gmra.mxu1 %vm1854_vm2, %v363_v23 }
 0x103   :  { %4287 = vmatprep.mubr.msk.f32.mxu0 %vm4445_vm1, %v4444_v1  ;;  %4292 = vmatprep.mubr.msk.f32.mxu1 %vm4445_vm1, %v4444_v1 }
 0x106   :  { %v1036_v25 = vpop.f32.mrf.mxu0  ;;  %v1106_v26 = vpop.f32.mrf.mxu1 }
 0x107   :  { %v1037_v28 = vadd.f32 %v3778_v24, %v1036_v25  ;;  %v1107_v29 = vadd.f32 %v3778_v24, %v1106_v26 }
 0x108   :  { %v4143_v30 = vpop.f32.mrf.mxu0  ;;  %v4154_v31 = vpop.f32.mrf.mxu1 }
 0x109   :  { %4286 = vmatpush3.xpose.msk.msra.mxu0 %vm1854_vm2, %v1037_v28  ;;  %4291 = vmatpush3.xpose.msk.msra.mxu1 %vm1854_vm2, %v1107_v29 }
 0x10a   :  { %4295 = vmatprep.subr.mxu0 %v4444_v1  ;;  %4300 = vmatprep.subr.mxu1 %v4444_v1 }
 0x10c   :  { %4288 = vmatmul.mubr.msk.f32.vlgmr.msra.gmra.mxu0 %vm1854_vm2, %v433_v32  ;;  %4293 = vmatmul.mubr.msk.f32.vlgmr.msra.gmra.mxu1 %vm1854_vm2, %v503_v33 }
 0x10d   :  { %4297 = vmatprep.mubr.msk.f32.mxu0 %vm4445_vm1, %v4444_v1  ;;  %4302 = vmatprep.mubr.msk.f32.mxu1 %vm4445_vm1, %v4444_v1 }
 0x110   :  { %v1176_v35 = vpop.f32.mrf.mxu0  ;;  %v1246_v36 = vpop.f32.mrf.mxu1 }
 0x111   :  { %v1177_v38 = vadd.f32 %v3779_v34, %v1176_v35  ;;  %v1247_v39 = vadd.f32 %v3779_v34, %v1246_v36 }
 0x112   :  { %v4165_v40 = vpop.f32.mrf.mxu0  ;;  %v4176_v41 = vpop.f32.mrf.mxu1 }
 0x113   :  { %4296 = vmatpush3.xpose.msk.msra.mxu0 %vm1854_vm2, %v1177_v38  ;;  %4301 = vmatpush3.xpose.msk.msra.mxu1 %vm1854_vm2, %v1247_v39 }
 0x114   :  { %4305 = vmatprep.subr.mxu0 %v4444_v1  ;;  %4310 = vmatprep.subr.mxu1 %v4444_v1 }
 0x116   :  { %4298 = vmatmul.mubr.msk.f32.vlgmr.msra.gmra.mxu0 %vm1854_vm2, %v573_v42  ;;  %4303 = vmatmul.mubr.msk.f32.vlgmr.msra.gmra.mxu1 %vm1854_vm2, %v643_v43 }
 0x117   :  { %4307 = vmatprep.mubr.msk.f32.mxu0 %vm4445_vm1, %v4444_v1  ;;  %4312 = vmatprep.mubr.msk.f32.mxu1 %vm4445_vm1, %v4444_v1 }
 0x11b   :  { %v1360_v45 = vpop.f32.mrf.mxu0  ;;  %v1430_v46 = vpop.f32.mrf.mxu1 }
 0x11c   :  { %v1361_v47 = vadd.f32 %v3788_v44, %v1360_v45  ;;  %v1431_v48 = vadd.f32 %v3788_v44, %v1430_v46 }
 0x11d   :  { %v4187_v49 = vpop.f32.mrf.mxu0  ;;  %v4198_v50 = vpop.f32.mrf.mxu1 }
 0x11e   :  { %4306 = vmatpush3.msra.mxu0 %v1361_v47  ;;  %4311 = vmatpush3.msra.mxu1 %v1431_v48 }
 0x11f   :  { %4315 = vmatprep.subr.mxu0 %v4444_v1  ;;  %4320 = vmatprep.subr.mxu1 %v4444_v1 }
 0x125   :  { %v4926_v51 = vpop.f32.mrf.mxu0  ;;  %v4928_v52 = vpop.f32.mrf.mxu1 }
 0x127   :  { %v4209_v53 = vpop.f32.mrf.mxu0  ;;  %v4220_v54 = vpop.f32.mrf.mxu1 }
 0x12f   :  { %v4930_v55 = vpop.f32.mrf.mxu0  ;;  %v4932_v56 = vpop.f32.mrf.mxu1 }
 0x131   :  { %v4231_v57 = vpop.f32.mrf.mxu0  ;;  %v4242_v58 = vpop.f32.mrf.mxu1 }
 0x138   :  { %v4934_v59 = vpop.f32.mrf.mxu0  ;;  %v4936_v60 = vpop.f32.mrf.mxu1 }
 0x13a   :  { %v4253_v61 = vpop.f32.mrf.mxu0  ;;  %v4264_v62 = vpop.f32.mrf.mxu1 }
 0x1b8   :  { %v1927_v63 = vpop.f32.mrf.mxu0  ;;  %v2003_v0 = vpop.f32.mrf.mxu1 }
 0x1b9   :  { %v2463_v2 = vmul.f32 0.17677669, %v1927_v63  ;;  %v2464_v5 = vmul.f32 0.17677669, %v2003_v0 }
 0x1ba   :  { %v4269_v3 = vpop.f32.mrf.mxu0  ;;  %v4274_v4 = vpop.f32.mrf.mxu1 }
 0x1bb   :  { %v2471_v6 = vsel %vm1854_vm2, %v2463_v2, -inf  ;;  %v2474_v7 = vsel %vm1854_vm2, %v2464_v5, -inf }
 0x1bc   :  { %2472 = vmax.xlane.f32.xlu0 %v2471_v6 }
 0x1c0   :  { %2475 = vmax.xlane.f32.xlu0 %v2474_v7 }
 0x1c2   :  { %v2155_v8 = vpop.f32.mrf.mxu1  ;;  %v2079_v9 = vpop.f32.mrf.mxu0 }
 0x1c3   :  { %v2465_v10 = vmul.f32 0.17677669, %v2079_v9  ;;  %v2466_v13 = vmul.f32 0.17677669, %v2155_v8 }
 0x1c4   :  { %v4279_v11 = vpop.f32.mrf.mxu0  ;;  %v4284_v12 = vpop.f32.mrf.mxu1 }
 0x1c5   :  { %v2477_v14 = vsel %vm1854_vm2, %v2465_v10, -inf  ;;  %v2480_v15 = vsel %vm1854_vm2, %v2466_v13, -inf }
 0x1c6   :  { %2478 = vmax.xlane.f32.xlu1 %v2477_v14 }
 0x1ca   :  { %2481 = vmax.xlane.f32.xlu1 %v2480_v15 }
 0x1cc   :  { %v2307_v16 = vpop.f32.mrf.mxu1  ;;  %v2231_v17 = vpop.f32.mrf.mxu0 }
 0x1cd   :  { %v2468_v18 = vmul.f32 0.17677669, %v2307_v16  ;;  %v2467_v19 = vmul.f32 0.17677669, %v2231_v17 }
 0x1ce   :  { %v4289_v20 = vpop.f32.mrf.mxu0  ;;  %v4294_v21 = vpop.f32.mrf.mxu1 }
 0x1cf   :  { %v2486_v22 = vsel %vm1854_vm2, %v2468_v18, -inf  ;;  %v2483_v23 = vsel %vm1854_vm2, %v2467_v19, -inf }
 0x1d0   :  { %2487 = vmax.xlane.f32.xlu1 %v2486_v22  ;;  %2484 = vmax.xlane.f32.xlu0 %v2483_v23 }
 0x1d6   :  { %v2383_v24 = vpop.f32.mrf.mxu0  ;;  %v2459_v25 = vpop.f32.mrf.mxu1 }
 0x1d7   :  { %v2469_v26 = vmul.f32 0.17677669, %v2383_v24  ;;  %v2470_v27 = vmul.f32 0.17677669, %v2459_v25 }
 0x1d8   :  { %v4299_v28 = vpop.f32.mrf.mxu0  ;;  %v4304_v29 = vpop.f32.mrf.mxu1 }
 0x1d9   :  { %v2492_v30 = vsel %vm1854_vm2, %v2470_v27, -inf  ;;  %v2489_v31 = vsel %vm1854_vm2, %v2469_v26, -inf }
 0x1da   :  { %2493 = vmax.xlane.f32.xlu1 %v2492_v30  ;;  %2490 = vmax.xlane.f32.xlu0 %v2489_v31 }
 0x245   :  { %v2473_v32 = vpop.xlane.xlu0 %2472 }
 0x246   :  { %v2495_v33 = vsub.f32 %v2463_v2, %v2473_v32 }
 0x248   :  { %v2503_v34 = vmul.f32 1.442695, %v2495_v33 }
 0x249   :  { %v2476_v35 = vpop.xlane.xlu0 %2475 }
 0x24a   :  { %4390 = vpow2.f32 %v2503_v34  ;;  %v2496_v36 = vsub.f32 %v2464_v5, %v2476_v35  ;;  %v3791_v35 = vld [vmem:[%s5059_s6 + $0x3] ss:$0 sm:$0xff] }
 0x24c   :  { %v2505_v37 = vmul.f32 1.442695, %v2496_v36 }
 0x24e   :  { %4392 = vpow2.f32 %v2505_v37 }
 0x24f   :  { %v2479_v38 = vpop.xlane.xlu1 %2478 }
 0x250   :  { %v2497_v39 = vsub.f32 %v2465_v10, %v2479_v38 }
 0x252   :  { %v2507_v40 = vmul.f32 1.442695, %v2497_v39  ;;  %v1781_v39 = vadd.f32 %v3791_v35, %v4934_v59 }
 0x253   :  { %v2482_v41 = vpop.xlane.xlu1 %2481 }
 0x254   :  { %4394 = vpow2.f32 %v2507_v40  ;;  %v2498_v42 = vsub.f32 %v2466_v13, %v2482_v41 }
 0x256   :  { %v2509_v43 = vmul.f32 1.442695, %v2498_v42  ;;  %v3143_v42 = vld [vmem:[%s5060_s7] sm:$0xff] }
 0x257   :  { %v4391_v44 = vpop.eup %4390 }
 0x258   :  { %4396 = vpow2.f32 %v2509_v43  ;;  %v2519_v45 = vsel %vm1854_vm2, %v4391_v44, 0.0  ;;  %v3144_v43 = vld [vmem:[%s5060_s7 + $0x8] sm:$0xff] }
 0x259   :  { %v2488_v46 = vpop.xlane.xlu1 %2487  ;;  %v2485_v47 = vpop.xlane.xlu0 %2484  ;;  %2520 = vadd.xlane.f32.xlu0 %v2519_v45 }
 0x25a   :  { %v2500_v48 = vsub.f32 %v2468_v18, %v2488_v46  ;;  %v2499_v49 = vsub.f32 %v2467_v19, %v2485_v47  ;;  %v3789_v18 = vld [vmem:[%s5059_s6 + $0x1] ss:$0 sm:$0xff] }
 0x25b   :  { %v4393_v50 = vpop.eup %4392  ;;  %v1501_v22 = vadd.f32 %v3789_v18, %v4926_v51  ;;  %v1571_v25 = vadd.f32 %v3789_v18, %v4928_v52  ;;  %v3790_v51 = vld [vmem:[%s5059_s6 + $0x2] ss:$0 sm:$0xff] }
 0x25c   :  { %v2513_v53 = vmul.f32 1.442695, %v2500_v48  ;;  %v2511_v54 = vmul.f32 1.442695, %v2499_v49  ;;  %v2522_v57 = vsel %vm1854_vm2, %v4393_v50, 0.0  ;;  %v1641_v52 = vadd.f32 %v3790_v51, %v4930_v55  ;;  %v3145_v48 = vld [vmem:[%s5060_s7 + $0x10] sm:$0xff] }
 0x25d   :  { %2523 = vadd.xlane.f32.xlu1 %v2522_v57  ;;  %v1711_v32 = vadd.f32 %v3790_v51, %v4932_v56  ;;  %v1851_v56 = vadd.f32 %v3791_v35, %v4936_v60  ;;  %v3146_v57 = vld [vmem:[%s5060_s7 + $0x18] sm:$0xff] }
 0x25e   :  { %4398 = vpow2.f32 %v2513_v53 }
 0x25f   :  { %4400 = vpow2.f32 %v2511_v54 }
 0x261   :  { %v4395_v58 = vpop.eup %4394 }
 0x262   :  { %v2525_v61 = vsel %vm1854_vm2, %v4395_v58, 0.0 }
 0x263   :  { %v2494_v62 = vpop.xlane.xlu1 %2493  ;;  %v2491_v63 = vpop.xlane.xlu0 %2490  ;;  %2526 = vadd.xlane.f32.xlu0 %v2525_v61 }
 0x264   :  { %v2502_v0 = vsub.f32 %v2470_v27, %v2494_v62  ;;  %v2501_v2 = vsub.f32 %v2469_v26, %v2491_v63 }
 0x265   :  { %v4397_v3 = vpop.eup %4396 }
 0x266   :  { %v2517_v4 = vmul.f32 1.442695, %v2502_v0  ;;  %v2515_v5 = vmul.f32 1.442695, %v2501_v2  ;;  %v2528_v6 = vsel %vm1854_vm2, %v4397_v3, 0.0 }
 0x267   :  { %2529 = vadd.xlane.f32.xlu1 %v2528_v6 }
 0x268   :  { %4402 = vpow2.f32 %v2517_v4 }
 0x269   :  { %4404 = vpow2.f32 %v2515_v5 }
 0x26b   :  { %v4399_v7 = vpop.eup %4398 }
 0x26c   :  { %v4401_v8 = vpop.eup %4400  ;;  %v2534_v9 = vsel %vm1854_vm2, %v4399_v7, 0.0 }
 0x26d   :  { %2535 = vadd.xlane.f32.xlu1 %v2534_v9  ;;  %v2531_v10 = vsel %vm1854_vm2, %v4401_v8, 0.0 }
 0x26e   :  { %2532 = vadd.xlane.f32.xlu0 %v2531_v10 }
 0x275   :  { %v4952_v11 = vpop.eup %4402 }
 0x276   :  { %v4954_v12 = vpop.eup %4404  ;;  %v2540_v13 = vsel %vm1854_vm2, %v4952_v11, 0.0 }
 0x277   :  { %2541 = vadd.xlane.f32.xlu1 %v2540_v13  ;;  %v2537_v14 = vsel %vm1854_vm2, %v4954_v12, 0.0 }
 0x278   :  { %2538 = vadd.xlane.f32.xlu0 %v2537_v14 }
 0x2e2   :  { %v2521_v15 = vpop.xlane.xlu0 %2520 }
 0x2e3   :  { %4406 = vrcp.f32 %v2521_v15 }
 0x2e6   :  { %v2524_v16 = vpop.xlane.xlu1 %2523 }
 0x2e7   :  { %4408 = vrcp.f32 %v2524_v16 }
 0x2ec   :  { %v2527_v17 = vpop.xlane.xlu0 %2526 }
 0x2ed   :  { %4410 = vrcp.f32 %v2527_v17 }
 0x2f0   :  { %v4407_v19 = vpop.eup %4406  ;;  %v2530_v20 = vpop.xlane.xlu1 %2529 }
 0x2f1   :  { %4412 = vrcp.f32 %v2530_v20  ;;  %v2551_v21 = vmul.f32 %v4407_v19, %v4391_v44 }
 0x2f3   :  { %4308 = vmatmul.mubr.msk.f32.vlgmr.msra.gmra.mxu0 %vm1854_vm2, %v2551_v21 }
 0x2f4   :  { %v4409_v23 = vpop.eup %4408  ;;  %4316 = vmatpush3.msra.mxu0 %v1501_v22  ;;  %4317 = vmatprep.mubr.msk.f32.mxu0 %vm4445_vm1, %v4444_v1 }
 0x2f5   :  { %v2552_v24 = vmul.f32 %v4409_v23, %v4393_v50  ;;  %4325 = vmatprep.subr.mxu0 %v4444_v1 }
 0x2f6   :  { %v2536_v26 = vpop.xlane.xlu1 %2535 }
 0x2f7   :  { %4414 = vrcp.f32 %v2536_v26  ;;  %v2533_v27 = vpop.xlane.xlu0 %2532  ;;  %4313 = vmatmul.mubr.msk.f32.vlgmr.msra.gmra.mxu1 %vm1854_vm2, %v2552_v24 }
 0x2f8   :  { %4416 = vrcp.f32 %v2533_v27  ;;  %4321 = vmatpush3.msra.mxu1 %v1571_v25  ;;  %4322 = vmatprep.mubr.msk.f32.mxu1 %vm4445_vm1, %v4444_v1 }
 0x2f9   :  { %4330 = vmatprep.subr.mxu1 %v4444_v1 }
 0x2fa   :  { %v4411_v28 = vpop.eup %4410 }
 0x2fb   :  { %v2553_v29 = vmul.f32 %v4411_v28, %v4395_v58 }
 0x2fd   :  { %4318 = vmatmul.mubr.msk.f32.vlgmr.msra.gmra.mxu0 %vm1854_vm2, %v2553_v29 }
 0x2fe   :  { %v4413_v30 = vpop.eup %4412  ;;  %4326 = vmatpush3.msra.mxu0 %v1641_v52  ;;  %4327 = vmatprep.mubr.msk.f32.mxu0 %vm4445_vm1, %v4444_v1 }
 0x2ff   :  { %v2554_v31 = vmul.f32 %v4413_v30, %v4397_v3  ;;  %4335 = vmatprep.subr.mxu0 %v4444_v1 }
 0x300   :  { %v2542_v33 = vpop.xlane.xlu1 %2541 }
 0x301   :  { %4418 = vrcp.f32 %v2542_v33  ;;  %v2539_v34 = vpop.xlane.xlu0 %2538  ;;  %4323 = vmatmul.mubr.msk.f32.vlgmr.msra.gmra.mxu1 %vm1854_vm2, %v2554_v31 }
 0x302   :  { %4420 = vrcp.f32 %v2539_v34  ;;  %4331 = vmatpush3.msra.mxu1 %v1711_v32  ;;  %4332 = vmatprep.mubr.msk.f32.mxu1 %vm4445_vm1, %v4444_v1 }
 0x303   :  { %4340 = vmatprep.subr.mxu1 %v4444_v1 }
 0x304   :  { %v4415_v55 = vpop.eup %4414 }
 0x305   :  { %v4417_v36 = vpop.eup %4416  ;;  %v2556_v37 = vmul.f32 %v4415_v55, %v4399_v7 }
 0x306   :  { %v2555_v38 = vmul.f32 %v4417_v36, %v4401_v8 }
 0x307   :  { %4333 = vmatmul.mubr.msk.f32.vlgmr.msra.gmra.mxu1 %vm1854_vm2, %v2556_v37 }
 0x308   :  { %4328 = vmatmul.mubr.msk.f32.vlgmr.msra.gmra.mxu0 %vm1854_vm2, %v2555_v38  ;;  %4341 = vmatpush3.msra.mxu1 %v1851_v56 }
 0x309   :  { %4336 = vmatpush3.msra.mxu0 %v1781_v39  ;;  %4337 = vmatprep.mubr.msk.f32.mxu0 %vm4445_vm1, %v4444_v1 }
 0x30a   :  { %4342 = vmatprep.mubr.msk.f32.mxu1 %vm4445_vm1, %v4444_v1  ;;  %4345 = vmatprep.subr.mxu0 %v4444_v1 }
 0x30b   :  { %4350 = vmatprep.subr.mxu1 %v4444_v1 }
 0x30e   :  { %v4419_v60 = vpop.eup %4418 }
 0x30f   :  { %v4421_v40 = vpop.eup %4420  ;;  %v2558_v59 = vmul.f32 %v4419_v60, %v4952_v11 }
 0x310   :  { %v2557_v41 = vmul.f32 %v4421_v40, %v4954_v12 }
 0x311   :  { %4343 = vmatmul.mubr.msk.f32.vlgmr.msra.gmra.mxu1 %vm1854_vm2, %v2558_v59 }
 0x312   :  { %4338 = vmatmul.mubr.msk.f32.vlgmr.msra.gmra.mxu0 %vm1854_vm2, %v2557_v41  ;;  %4352 = vmatprep.mubr.msk.f32.mxu1 %vm4445_vm1, %v4444_v1 }
 0x313   :  { %4347 = vmatprep.mubr.msk.f32.mxu0 %vm4445_vm1, %v4444_v1  ;;  %4346 = vmatpush3.msra.mxu0 %v3143_v42 }
 0x314   :  { %4351 = vmatpush3.msra.mxu1 %v3143_v42  ;;  %4355 = vmatprep.subr.mxu0 %v4444_v1 }
 0x315   :  { %4360 = vmatprep.subr.mxu1 %v4444_v1 }
 0x3b3   :  { %v2628_v44 = vpop.f32.mrf.mxu0 }
 0x3b4   :  { %4348 = vmatmul.mubr.msk.f32.vlgmr.msra.gmra.mxu0 %vm1854_vm2, %v2628_v44 }
 0x3b5   :  { %v4309_v45 = vpop.f32.mrf.mxu0  ;;  %4356 = vmatpush3.msra.mxu0 %v3144_v43  ;;  %4357 = vmatprep.mubr.msk.f32.mxu0 %vm4445_vm1, %v4444_v1 }
 0x3b6   :  { %4365 = vmatprep.subr.mxu0 %v4444_v1 }
 0x3b7   :  { %v2701_v46 = vpop.f32.mrf.mxu1 }
 0x3b8   :  { %4353 = vmatmul.mubr.msk.f32.vlgmr.msra.gmra.mxu1 %vm1854_vm2, %v2701_v46 }
 0x3b9   :  { %v4314_v47 = vpop.f32.mrf.mxu1  ;;  %4361 = vmatpush3.msra.mxu1 %v3144_v43  ;;  %4362 = vmatprep.mubr.msk.f32.mxu1 %vm4445_vm1, %v4444_v1 }
 0x3ba   :  { %4370 = vmatprep.subr.mxu1 %v4444_v1 }
 0x3bd   :  { %v2774_v49 = vpop.f32.mrf.mxu0 }
 0x3be   :  { %4358 = vmatmul.mubr.msk.f32.vlgmr.msra.gmra.mxu0 %vm1854_vm2, %v2774_v49 }
 0x3bf   :  { %v4319_v50 = vpop.f32.mrf.mxu0  ;;  %4366 = vmatpush3.msra.mxu0 %v3145_v48  ;;  %4367 = vmatprep.mubr.msk.f32.mxu0 %vm4445_vm1, %v4444_v1 }
 0x3c0   :  { %4375 = vmatprep.subr.mxu0 %v4444_v1 }
 0x3c1   :  { %v2847_v53 = vpop.f32.mrf.mxu1 }
 0x3c2   :  { %4363 = vmatmul.mubr.msk.f32.vlgmr.msra.gmra.mxu1 %vm1854_vm2, %v2847_v53 }
 0x3c3   :  { %v4324_v54 = vpop.f32.mrf.mxu1  ;;  %4371 = vmatpush3.msra.mxu1 %v3145_v48  ;;  %4372 = vmatprep.mubr.msk.f32.mxu1 %vm4445_vm1, %v4444_v1 }
 0x3c4   :  { %4380 = vmatprep.subr.mxu1 %v4444_v1 }
 0x3c7   :  { %v2993_v58 = vpop.f32.mrf.mxu1 }
 0x3c8   :  { %v2920_v61 = vpop.f32.mrf.mxu0  ;;  %4373 = vmatmul.mubr.msk.f32.vlgmr.msra.gmra.mxu1 %vm1854_vm2, %v2993_v58 }
 0x3c9   :  { %4368 = vmatmul.mubr.msk.f32.vlgmr.msra.gmra.mxu0 %vm1854_vm2, %v2920_v61  ;;  %v4334_v62 = vpop.f32.mrf.mxu1  ;;  %4381 = vmatpush3.msra.mxu1 %v3146_v57 }
 0x3ca   :  { %v4329_v63 = vpop.f32.mrf.mxu0  ;;  %4376 = vmatpush3.msra.mxu0 %v3146_v57  ;;  %4377 = vmatprep.mubr.msk.f32.mxu0 %vm4445_vm1, %v4444_v1 }
 0x3cb   :  { %4382 = vmatprep.mubr.msk.f32.mxu1 %vm4445_vm1, %v4444_v1  ;;  %v3832_v1 = vld [vmem:[%s5061_s8] ss:$0 sm:$0xff]  ;;  %s4422_s8 = scalar_lea.vmem %s3754_s21, 256 }
 0x3cc   :  { %p4423_p0 = scmp.ne.s32.totalorder %s3754_s21, %s4422_s8  ;;  %p4428_p2 = scmp.lt.s32.totalorder %s4422_s8, %s4422_s8 }
 0x3ce   :  { %p4429_p3 = por %p4428_p2, %p4427_p1 }
 0x3d0   :  { %p4430_p4 = pnand %p4429_p3, %p4423_p0 }
 0x3d1   :  { %v3139_v0 = vpop.f32.mrf.mxu1 }
 0x3d2   :  { %v3066_v2 = vpop.f32.mrf.mxu0  ;;  %4383 = vmatmul.mubr.msk.f32.vlgmr.msra.gmra.mxu1 %vm1854_vm2, %v3139_v0 }
 0x3d3   :  { %4378 = vmatmul.mubr.msk.f32.vlgmr.msra.gmra.mxu0 %vm1854_vm2, %v3066_v2  ;;  %v4344_v3 = vpop.f32.mrf.mxu1 }
 0x3d4   :  { %v4339_v4 = vpop.f32.mrf.mxu0 }
 0x474   :  { %v3216_v5 = vpop.f32.mrf.mxu0 }
 0x475   :  { %v3738_v18 = vadd.f32 %v3832_v1, %v3216_v5 }
 0x476   :  { %v4349_v6 = vpop.f32.mrf.mxu0 }
 0x478   :  { %v3289_v7 = vpop.f32.mrf.mxu1 }
 0x479   :  { %v3739_v17 = vadd.f32 %v3832_v1, %v3289_v7 }
 0x47a   :  { %v4354_v8 = vpop.f32.mrf.mxu1 }
 0x47e   :  { %v3362_v9 = vpop.f32.mrf.mxu0 }
 0x47f   :  { %v3740_v20 = vadd.f32 %v3738_v18, %v3362_v9 }
 0x480   :  { %v4359_v10 = vpop.f32.mrf.mxu0 }
 0x482   :  { %v3435_v11 = vpop.f32.mrf.mxu1 }
 0x483   :  { %v3741_v19 = vadd.f32 %v3739_v17, %v3435_v11 }
 0x484   :  { %v4364_v12 = vpop.f32.mrf.mxu1 }
 0x488   :  { %v3581_v13 = vpop.f32.mrf.mxu1 }
 0x489   :  { %v3508_v14 = vpop.f32.mrf.mxu0  ;;  %v3743_v21 = vadd.f32 %v3741_v19, %v3581_v13 }
 0x48a   :  { %v4374_v15 = vpop.f32.mrf.mxu1  ;;  %v3742_v22 = vadd.f32 %v3740_v20, %v3508_v14 }
 0x48b   :  { %v4369_v16 = vpop.f32.mrf.mxu0 }
 0x492   :  { %v3727_v23 = vpop.f32.mrf.mxu1 }
 0x493   :  { %v3654_v24 = vpop.f32.mrf.mxu0  ;;  %v3745_v25 = vadd.f32 %v3743_v21, %v3727_v23 }
 0x494   :  { %v3744_v26 = vadd.f32 %v3742_v22, %v3654_v24  ;;  %v4384_v27 = vpop.f32.mrf.mxu1 }
 0x495   :  { %3747 = vst.msk [vmem:[#allocation2 + $0x8] sm:$0xff] %vm79_vm0, %v3745_v25  ;;  %v4379_v51 = vpop.f32.mrf.mxu0 }
 0x496   :  { %3746 = vst.msk [vmem:[#allocation2] sm:$0xff] %vm79_vm0, %v3744_v26 }
 0x497   :  { %4433 = shalt.err (!%p4430_p4)
}
 0x498   :  { %s4447_s22 = smov 128   ;;  %s4448_s0 = smov 8  }
 0x499   :  { %3759 = dma.vmem_to_hbm [thread:$0]  %s3754_s21, 256, %s5062_s9, [#allocation3], %s4447_s22, %s4447_s22, %s4448_s0  }
 0x49a   :  { %4442 = dma.done.wait [#allocation3], 256  }
 0x49b   :  { %4443 = vsyncadd [#allocation3], 4294967040 }
 0x49c   :  { %3763 = vsyncpa [#allocation3], 1 }

</bundles_post_ra>
